<compile_context>
chip_gen: v6e
topology: v6e:2x2x1
jax: 0.10.0
libtpu: 0.0.40
codegen_flags: <defaults>
</compile_context>

<pallas_src>
from typing import NamedTuple

import jax
import jax.numpy as jnp
from jax.experimental import pallas as pl
from jax.experimental.pallas import tpu as pltpu


def _round_up(v, m):
    return (v + m - 1) // m * m


def _cdiv(a, b):
    return -(-a // b)


# --------------------------------------------------------------------------
# Kernels
# --------------------------------------------------------------------------
def _mlp_resident_kernel(x_ref, w1_ref, b1_ref, w2_ref, b2_ref, o_ref):
    # x_ref: [TILE_B, K] (f32)   w1_ref: [K, H]   b1_ref: [1, H] (f32)
    # w2_ref: [H, N]             b2_ref: [1, N]   o_ref: [TILE_B, N]
    x = x_ref[...].astype(w1_ref.dtype)              # cast in-kernel (no HBM copy)
    h = jnp.dot(x, w1_ref[...], preferred_element_type=jnp.float32)
    # Bias + tanh in f32 (v5e has no bf16 VPU/EUP path; EUP slot is free anyway).
    h = jnp.tanh(h + b1_ref[...])
    y = jnp.dot(h.astype(w2_ref.dtype), w2_ref[...],
                preferred_element_type=jnp.float32)
    o_ref[...] = (y + b2_ref[...]).astype(o_ref.dtype)


def _mlp_hchunk_kernel(x_ref, w1_ref, b1_ref, w2_ref, b2_ref, o_ref, acc_ref):
    # Hidden dim tiled as a reduction axis (grid axis 1, "arbitrary").
    # x_ref: [TILE_B, K]  w1_ref: [K, TH]  b1_ref: [1, TH]
    # w2_ref: [TH, N]     b2_ref: [1, N]   o_ref: [TILE_B, N]  acc_ref f32 scratch
    h_idx = pl.program_id(1)

    @pl.when(h_idx == 0)
    def _():
        acc_ref[...] = jnp.zeros_like(acc_ref)

    x = x_ref[...].astype(w1_ref.dtype)
    h = jnp.dot(x, w1_ref[...], preferred_element_type=jnp.float32)
    h = jnp.tanh(h + b1_ref[...])
    acc_ref[...] += jnp.dot(h.astype(w2_ref.dtype), w2_ref[...],
                            preferred_element_type=jnp.float32)

    @pl.when(h_idx == pl.num_programs(1) - 1)
    def _():
        o_ref[...] = (acc_ref[...] + b2_ref[...]).astype(o_ref.dtype)


# --------------------------------------------------------------------------
# One-time parameter preparation (hoisted out of the per-call hot path)
# --------------------------------------------------------------------------
class ModuleNetParams(NamedTuple):
    w1: jax.Array          # [K, Hp]  compute dtype
    b1: jax.Array          # [1, Hp]  f32
    w2: jax.Array          # [Hp, N]  compute dtype
    b2: jax.Array          # [1, N]   f32
    num_hidden: int        # unpadded H (for cost accounting)
    h_chunk: int           # 0 -> resident-weight kernel; >0 -> H-reduction kernel


def prepare_params(w1, b1, w2, b2, *, compute_dtype=jnp.bfloat16,
                   max_resident_weight_bytes=12 << 20, h_chunk=None):
    """One-time prep: cast params to the MXU operand dtype and, only when the
    hidden dim must be tiled, pad H so the chunk size divides it (zero padding
    is inert: bias 0 -> tanh(0)=0 -> multiplies zero rows of w2)."""
    K, H = w1.shape
    N = w2.shape[1]
    wsz = jnp.dtype(compute_dtype).itemsize
    # x2 because the default pipeline double-buffers even constant-index blocks.
    resident_vmem = 2 * ((K * H + H * N) * wsz + (H + N) * 4)
    use_chunked = (resident_vmem > max_resident_weight_bytes) or (h_chunk is not None)

    if not use_chunked:
        return ModuleNetParams(
            w1=w1.astype(compute_dtype),
            b1=b1.astype(jnp.float32).reshape(1, H),
            w2=w2.astype(compute_dtype),
            b2=b2.astype(jnp.float32).reshape(1, N),
            num_hidden=H, h_chunk=0)

    if h_chunk is None:
        h_chunk = 512
    h_chunk = _round_up(min(h_chunk, H), 128)
    Hp = _round_up(H, h_chunk)
    w1p = jnp.zeros((K, Hp), compute_dtype).at[:, :H].set(w1.astype(compute_dtype))
    b1p = jnp.zeros((1, Hp), jnp.float32).at[0, :H].set(b1.astype(jnp.float32))
    w2p = jnp.zeros((Hp, N), compute_dtype).at[:H, :].set(w2.astype(compute_dtype))
    b2p = b2.astype(jnp.float32).reshape(1, N)
    return ModuleNetParams(w1p, b1p, w2p, b2p, num_hidden=H, h_chunk=h_chunk)


# --------------------------------------------------------------------------
# Forward
# --------------------------------------------------------------------------
def module_net_forward(x, params: ModuleNetParams, *, out_dtype=None,
                       tile_b=None, vmem_budget_bytes=32 << 20):
    """x: [B, num_input] -> [B, num_output].  `params` from prepare_params.
    Set out_dtype=jnp.bfloat16 to halve the output HBM write if downstream
    consumers allow it (default keeps x.dtype)."""
    B, K = x.shape
    Hp = params.w1.shape[1]
    N = params.w2.shape[1]
    H = params.num_hidden
    h_chunk = params.h_chunk
    out_dtype = x.dtype if out_dtype is None else out_dtype

    w_itemsize = jnp.dtype(params.w1.dtype).itemsize
    x_itemsize = jnp.dtype(x.dtype).itemsize
    o_itemsize = jnp.dtype(out_dtype).itemsize

    # Weight slab held in VMEM per grid step (double-buffered by the pipeline).
    kslab_h = h_chunk if h_chunk else Hp
    weights_vmem = 2 * ((K * kslab_h + kslab_h * N) * w_itemsize
                        + (kslab_h + N) * 4)

    # ---- batch tile selection (VMEM budget safe for v7x's 64 MiB) ----------
    if tile_b is None:
        tile_b = 1024                       # large tiles approach the HBM roofline
    b_cap = _round_up(B, 8)
    if b_cap >= 16:
        # >= 2 grid steps so the "parallel" axis actually feeds both v7x cores.
        b_cap = min(b_cap, _round_up(_cdiv(B, 2), 8))
    tile = max(8, min(_round_up(tile_b, 8), b_cap))

    def _vmem_need(t):
        return (2 * t * K * x_itemsize          # x tile, double-buffered
                + 2 * t * N * o_itemsize        # out tile, double-buffered
                + t * kslab_h * 4               # f32 hidden intermediate
                + t * N * 4                     # f32 accumulator / epilogue temp
                + weights_vmem)

    while tile > 8 and _vmem_need(tile) > vmem_budget_bytes:
        tile = max(8, _round_up(tile // 2, 8))
    TILE_B = tile
    n_bt = _cdiv(B, TILE_B)                 # last tile may be ragged (writes masked)

    vmem_limit = int(max(_vmem_need(TILE_B) + (2 << 20), 32 << 20))

    flops = 2 * B * K * H + 2 * B * H * N
    bytes_accessed = (B * K * x_itemsize
                      + (K * Hp + Hp * N) * w_itemsize + (Hp + N) * 4
                      + B * N * o_itemsize)
    cost = pl.CostEstimate(flops=flops, transcendentals=B * H,
                           bytes_accessed=bytes_accessed)

    out_shape = jax.ShapeDtypeStruct((B, N), out_dtype)

    if h_chunk == 0:
        # Weights resident in VMEM; grid only over batch.
        return pl.pallas_call(
            _mlp_resident_kernel,
            out_shape=out_shape,
            grid=(n_bt,),
            in_specs=[
                pl.BlockSpec((TILE_B, K), lambda i: (i, 0)),   # x: tiled over batch
                pl.BlockSpec((K, Hp), lambda i: (0, 0)),       # w1: resident
                pl.BlockSpec((1, Hp), lambda i: (0, 0)),       # b1: resident
                pl.BlockSpec((Hp, N), lambda i: (0, 0)),       # w2: resident
                pl.BlockSpec((1, N), lambda i: (0, 0)),        # b2: resident
            ],
            out_specs=pl.BlockSpec((TILE_B, N), lambda i: (i, 0)),
            compiler_params=pltpu.CompilerParams(
                dimension_semantics=("parallel",),
                vmem_limit_bytes=vmem_limit),
            cost_estimate=cost,
        )(x, params.w1, params.b1, params.w2, params.b2)

    # Large hidden: tile H as a reduction axis (last, "arbitrary") with a f32
    # accumulator in scratch.  x / output block indices don't change across the
    # H axis, so they are fetched / written back only once per batch tile.
    n_h = Hp // h_chunk
    return pl.pallas_call(
        _mlp_hchunk_kernel,
        out_shape=out_shape,
        grid=(n_bt, n_h),
        in_specs=[
            pl.BlockSpec((TILE_B, K), lambda i, h: (i, 0)),
            pl.BlockSpec((K, h_chunk), lambda i, h: (0, h)),
            pl.BlockSpec((1, h_chunk), lambda i, h: (0, h)),
            pl.BlockSpec((h_chunk, N), lambda i, h: (h, 0)),
            pl.BlockSpec((1, N), lambda i, h: (0, 0)),
        ],
        out_specs=pl.BlockSpec((TILE_B, N), lambda i, h: (i, 0)),
        scratch_shapes=[pltpu.VMEM((TILE_B, N), jnp.float32)],
        compiler_params=pltpu.CompilerParams(
            dimension_semantics=("parallel", "arbitrary"),
            vmem_limit_bytes=vmem_limit),
        cost_estimate=cost,
    )(x, params.w1, params.b1, params.w2, params.b2)


# --------------------------------------------------------------------------
# Demo / self-test
# --------------------------------------------------------------------------
if __name__ == "__main__":
    key = jax.random.PRNGKey(0)
    k_test1, k_test2 = jax.random.split(key)

    def make_case(k, batch, ni, nh, no):
        kx, kw1, kb1, kw2, kb2 = jax.random.split(k, 5)
        x = jax.random.normal(kx, (batch, ni), dtype=jnp.float32)
        w1 = jax.random.uniform(kw1, (ni, nh), jnp.float32, -1.0, 1.0) / (ni ** 0.5)
        b1 = jax.random.uniform(kb1, (nh,), jnp.float32, -1.0, 1.0) / (ni ** 0.5)
        w2 = jax.random.uniform(kw2, (nh, no), jnp.float32, -1.0, 1.0) / (nh ** 0.5)
        b2 = jax.random.uniform(kb2, (no,), jnp.float32, -1.0, 1.0) / (nh ** 0.5)
        return x, w1, b1, w2, b2

    # ---- case 1: small shapes, resident-weight kernel ----------------------
    x, w1, b1, w2, b2 = make_case(k_test1, batch=8, ni=16, nh=32, no=8)
    params = prepare_params(w1, b1, w2, b2)          # one-time prep (hoisted)
    out = module_net_forward(x, params)
    jax.block_until_ready(out)
    ref = jnp.tanh(x @ w1 + b1) @ w2 + b2
    assert out.shape == ref.shape
    err = float(jnp.max(jnp.abs(out - ref)))
    assert jnp.allclose(out, ref, atol=3e-2, rtol=3e-2), err

    # ---- case 2: forces the H-reduction kernel + ragged batch tile ---------
    x, w1, b1, w2, b2 = make_case(k_test2, batch=52, ni=48, nh=256, no=24)
    params = prepare_params(w1, b1, w2, b2,
                            max_resident_weight_bytes=0, h_chunk=128)
    out = module_net_forward(x, params)
    jax.block_until_ready(out)
    ref = jnp.tanh(x @ w1 + b1) @ w2 + b2
    assert out.shape == ref.shape
    err = float(jnp.max(jnp.abs(out - ref)))
    assert jnp.allclose(out, ref, atol=3e-2, rtol=3e-2), err

    print("KERNEL_OK")
</pallas_src>

<mosaic_0001>
module attributes {stable_mosaic.version = 11 : i64} {
  func.func @_mlp_resident_kernel(%arg0: i32, %arg1: memref<8x16xf32, #tpu.memory_space<vmem>>, %arg2: memref<16x32xbf16, #tpu.memory_space<vmem>>, %arg3: memref<1x32xf32, #tpu.memory_space<vmem>>, %arg4: memref<32x8xbf16, #tpu.memory_space<vmem>>, %arg5: memref<1x8xf32, #tpu.memory_space<vmem>>, %arg6: memref<8x8xf32, #tpu.memory_space<vmem>>) attributes {dimension_semantics = [#tpu.dimension_semantics<parallel>], iteration_bounds = array<i64: 1>, scalar_prefetch = 0 : i64, scratch_operands = 0 : i64, tpu.core_type = #tpu.core_type<tc>, window_params = [{transform_indices = @transform_0, window_bounds = array<i64: 8, 16>}, {pipeline_mode = #tpu.pipeline_mode<synchronous>, transform_indices = @transform_1, window_bounds = array<i64: 16, 32>}, {pipeline_mode = #tpu.pipeline_mode<synchronous>, transform_indices = @transform_2, window_bounds = array<i64: 1, 32>}, {pipeline_mode = #tpu.pipeline_mode<synchronous>, transform_indices = @transform_3, window_bounds = array<i64: 32, 8>}, {pipeline_mode = #tpu.pipeline_mode<synchronous>, transform_indices = @transform_4, window_bounds = array<i64: 1, 8>}, {transform_indices = @transform_5, window_bounds = array<i64: 8, 8>}]} {
    %c0 = arith.constant 0 : index
    %c0_0 = arith.constant 0 : index
    %0 = vector.load %arg1[%c0, %c0_0] : memref<8x16xf32, #tpu.memory_space<vmem>>, vector<8x16xf32>
    %1 = arith.truncf %0 : vector<8x16xf32> to vector<8x16xbf16>
    %c0_1 = arith.constant 0 : index
    %c0_2 = arith.constant 0 : index
    %2 = vector.load %arg2[%c0_1, %c0_2] : memref<16x32xbf16, #tpu.memory_space<vmem>>, vector<16x32xbf16>
    %cst = arith.constant dense<0.000000e+00> : vector<8x32xf32>
    %3 = tpu.matmul %1, %2, %cst {dimension_numbers = #tpu.dot_dimension_numbers<[1], [0], [0], [1], [0, 0, 1, 1], [], []>} : vector<8x16xbf16>, vector<16x32xbf16>, vector<8x32xf32> -> vector<8x32xf32>
    %c0_3 = arith.constant 0 : index
    %c0_4 = arith.constant 0 : index
    %4 = vector.load %arg3[%c0_3, %c0_4] : memref<1x32xf32, #tpu.memory_space<vmem>>, vector<1x32xf32>
    %5 = vector.broadcast %4 : vector<1x32xf32> to vector<8x32xf32>
    %6 = arith.addf %3, %5 : vector<8x32xf32>
    %7 = math.tanh %6 : vector<8x32xf32>
    %8 = arith.truncf %7 : vector<8x32xf32> to vector<8x32xbf16>
    %c0_5 = arith.constant 0 : index
    %c0_6 = arith.constant 0 : index
    %9 = vector.load %arg4[%c0_5, %c0_6] : memref<32x8xbf16, #tpu.memory_space<vmem>>, vector<32x8xbf16>
    %cst_7 = arith.constant dense<0.000000e+00> : vector<8x8xf32>
    %10 = tpu.matmul %8, %9, %cst_7 {dimension_numbers = #tpu.dot_dimension_numbers<[1], [0], [0], [1], [0, 0, 1, 1], [], []>} : vector<8x32xbf16>, vector<32x8xbf16>, vector<8x8xf32> -> vector<8x8xf32>
    %c0_8 = arith.constant 0 : index
    %c0_9 = arith.constant 0 : index
    %11 = vector.load %arg5[%c0_8, %c0_9] : memref<1x8xf32, #tpu.memory_space<vmem>>, vector<1x8xf32>
    %12 = vector.broadcast %11 : vector<1x8xf32> to vector<8x8xf32>
    %13 = arith.addf %10, %12 : vector<8x8xf32>
    %c0_10 = arith.constant 0 : index
    %c0_11 = arith.constant 0 : index
    %14 = vector.load %arg6[%c0_10, %c0_11] : memref<8x8xf32, #tpu.memory_space<vmem>>, vector<8x8xf32>
    tpu.vector_store %arg6[%c0_10, %c0_11], %13 {strides = array<i32>} : memref<8x8xf32, #tpu.memory_space<vmem>>, vector<8x8xf32>,
    return
  }
  func.func @transform_0(%arg0: i32) -> (i32, i32) {
    %c0_i32 = arith.constant 0 : i32
    %c0_i32_0 = arith.constant 0 : i32
    return %arg0, %c0_i32 : i32, i32
  }
  func.func @transform_1(%arg0: i32) -> (i32, i32) {
    %c0_i32 = arith.constant 0 : i32
    %c0_i32_0 = arith.constant 0 : i32
    %c0_i32_1 = arith.constant 0 : i32
    return %c0_i32, %c0_i32_0 : i32, i32
  }
  func.func @transform_2(%arg0: i32) -> (i32, i32) {
    %c0_i32 = arith.constant 0 : i32
    %c0_i32_0 = arith.constant 0 : i32
    %c0_i32_1 = arith.constant 0 : i32
    return %c0_i32, %c0_i32_0 : i32, i32
  }
  func.func @transform_3(%arg0: i32) -> (i32, i32) {
    %c0_i32 = arith.constant 0 : i32
    %c0_i32_0 = arith.constant 0 : i32
    %c0_i32_1 = arith.constant 0 : i32
    return %c0_i32, %c0_i32_0 : i32, i32
  }
  func.func @transform_4(%arg0: i32) -> (i32, i32) {
    %c0_i32 = arith.constant 0 : i32
    %c0_i32_0 = arith.constant 0 : i32
    %c0_i32_1 = arith.constant 0 : i32
    return %c0_i32, %c0_i32_0 : i32, i32
  }
  func.func @transform_5(%arg0: i32) -> (i32, i32) {
    %c0_i32 = arith.constant 0 : i32
    %c0_i32_0 = arith.constant 0 : i32
    return %arg0, %c0_i32 : i32, i32
  }
}

</mosaic_0001>

<bundles_post_ra>
// kernel: tpu_custom_call.1
= control target key start
LH: loop header
LB: loop body
LE: loop exit
PB: predicated region body
PF: predicated region fallthrough
CT: control target
= control target key end

     0   :  { %v224_v1 = vmov 0.0   ;;  %vm39_vm0 = vcmask 130048   ;;  %vm225_vm1 = vmmov 0   ;;  %s278_s0 = inlined_call_operand.vmem [shape: f32[8,16], index: 0, kind: input, shape index: {}]   ;;  %s279_s1 = inlined_call_operand.vmem [shape: bf16[16,32], index: 1, kind: input, shape index: {}]   ;;  %s280_s2 = inlined_call_operand.vmem [shape: f32[1,32], index: 2, kind: input, shape index: {}]   ;;  %s281_s3 = inlined_call_operand.vmem [shape: bf16[32,8], index: 3, kind: input, shape index: {}]   ;;  %s282_s4 = inlined_call_operand.vmem [shape: f32[1,8], index: 4, kind: input, shape index: {}]   ;;  %s283_s5 = inlined_call_operand.hbm [shape: f32[8,8], index: 5, kind: output, shape index: {}]  }
   0x1   :  { %v197_v0 = vld [vmem:[%s279_s1] sm:$0xff]   ;;  %180 = vmatprep.subr.bf16.mxu0 %v224_v1  ;;  %186 = vmatprep.subr.bf16.mxu1 %v224_v1 }
   0x2   :  { %v22_v2 = vld [vmem:[%s278_s0] sm:$0xff]  ;;  %181 = vmatpush3.bf16.msra.mxu0 %v197_v0  ;;  %182 = vmatprep.mubr.msk.bf16.mxu0 %vm225_vm1, %v224_v1 }
   0x3   :  { %v23_v3 = vpack.c.bf16 %v22_v2, %v22_v2  ;;  %190 = vmatprep.mubr.msk.bf16.mxu1 %vm225_vm1, %v224_v1 }
   0x4   :  { %10 = vsyncpa [#allocation3], 0  ;;  %v198_v4 = vld [vmem:[%s281_s3 + $0x8] sm:$0xff]   ;;  %v199_v5 = vld [vmem:[%s281_s3] sm:$0xff]   ;;  %vm108_vm2 = vcmask 261120   ;;  %s226_s3 = smov [#allocation2]  }
   0x5   :  { %183 = vmatmul.mubr.msk.bf16.vlgmr.msra.gmra.mxu0 %vm39_vm0, %v23_v3  ;;  %187 = vmatpush3.bf16.msra.mxu1 %v198_v4  ;;  %v168_v6 = vld [vmem:[%s280_s2] ss:$0 sm:$0xff]  ;;  %s160_s28 = sshll.u32 %s226_s3, 4  ;;  %vm152_vm3 = vcmask 64512   ;;  %s161_s28 = int_to_ptr.vmem [resolvable:$true] %s160_s28 }
   0x6   :  { %188 = vmatprep.subr.bf16.mxu1 %v224_v1  ;;  %v171_v14 = vld [vmem:[%s282_s4] ss:$0 sm:$0xff]  ;;  %s202_s2 = scalar_lea.vmem %s161_s28, 128  ;;  %p207_p1 = scmp.lt.s32.totalorder %s161_s28, %s161_s28 }
   0x7   :  { %p203_p0 = scmp.ne.s32.totalorder %s161_s28, %s202_s2  ;;  %p208_p2 = scmp.lt.s32.totalorder %s202_s2, %s202_s2 }
   0x9   :  { %189 = vmatpush3.bf16.msra.mxu1 %v199_v5  ;;  %p209_p3 = por %p208_p2, %p207_p1 }
   0xb   :  { %p210_p4 = pnand %p209_p3, %p203_p0 }
  0xc5   :  { %v77_v7 = vpop.f32.mrf.mxu0 }
  0xc6   :  { %v78_v8 = vadd.f32 %v168_v6, %v77_v7 }
  0xc7   :  { %v184_v9 = vpop.f32.mrf.mxu0 }
  0xc8   :  { %200 = vtanh.f32 %v78_v8 }
  0xc9   :  { %v80_v10 = vpop.f32.mrf.mxu0 }
  0xcb   :  { %v185_v11 = vpop.f32.mrf.mxu0 }
  0xd5   :  { %v201_v12 = vpop.eup %200 }
  0xd6   :  { %v84_v13 = vpack.c.bf16 %v201_v12, %v201_v12 }
  0xd8   :  { %191 = vmatmul.mubr.msk.bf16.vlgmr.msra.gmra.mxu1 %vm108_vm2, %v84_v13 }
 0x198   :  { %v146_v15 = vpop.f32.mrf.mxu1 }
 0x199   :  { %v147_v16 = vadd.f32 %v171_v14, %v146_v15 }
 0x19a   :  { %v192_v17 = vpop.f32.mrf.mxu1 }
 0x19b   :  { %153 = vst.msk [vmem:[#allocation2] sm:$0xff] %vm152_vm3, %v147_v16 }
 0x19c   :  { %v149_v18 = vpop.f32.mrf.mxu1 }
 0x19d   :  { %213 = shalt.err (!%p210_p4)
}
 0x19e   :  { %163 = dma.vmem_to_hbm [thread:$0]  %s161_s28, 128, %s283_s5, [#allocation3]   ;;  %v193_v19 = vpop.f32.mrf.mxu1 }
 0x19f   :  { %222 = dma.done.wait [#allocation3], 128  }
 0x1a0   :  { %223 = vsyncadd [#allocation3], 4294967168 }
 0x1a1   :  { %167 = vsyncpa [#allocation3], 1 }

</bundles_post_ra>
